<compile_context>
chip_gen: v7x
topology: tpu7x:2x2x1
jax: 0.10.0
libtpu: 0.0.40
codegen_flags: <defaults>
</compile_context>

<pallas_src>
import math
from functools import partial

import jax
import jax.numpy as jnp
from jax.experimental import pallas as pl
from jax.experimental.pallas import tpu as pltpu

NEG_FILL = -1e10  # torch masked_fill value

# ---- packed parameter buffer layout (row ranges of a (P_ROWS, 128) f32 buffer) ----
W1F_ROW, W1F_ROWS = 0, 16      # fused agent_fc1 / landmark_fc1      (16, 128)
W2F_ROW, W2F_ROWS = 16, 128    # fused agent_fc2 / landmark_fc2      (128, 64)
WI_ROW, WI_ROWS = 144, 64      # info_fc1                            (64, 64)
WA1_ROW, WA1_ROWS = 208, 64    # action_fc1                          (64, 64)
WA2_ROW, WA2_ROWS = 272, 64    # action_fc2 (padded to 128 lanes)    (64, 128)
BI_ROW = 336                   # info_fc1 bias                       (1, 64)
BA1_ROW = 344                  # action_fc1 bias                     (1, 64)
BA2_ROW = 352                  # action_fc2 bias                     (1, 128)
P_ROWS = 360


def policy_net_att_kernel(agent_ref, lm_ref, p_ref, out_ref, *, bt, num_landmark):
    """agent_ref: (bt, 16)      lanes [x, y, z, 1, 0...]
       lm_ref:    (bt*L, 16)    lanes [0..0, est_x, est_y, info_x, info_y, 1, mask, 0, 0]
       p_ref:     (P_ROWS, 128) packed weights + biases (VMEM-resident across grid)
       out_ref:   (bt, 128)     scaled actions in lanes 0:2 (lane-dense store)."""
    f32 = jnp.float32
    L = num_landmark
    relu = lambda v: jnp.maximum(v, 0.0)

    w1f = p_ref[W1F_ROW:W1F_ROW + W1F_ROWS, :]        # (16, 128)
    w2f = p_ref[W2F_ROW:W2F_ROW + W2F_ROWS, 0:64]     # (128, 64)
    wi = p_ref[WI_ROW:WI_ROW + WI_ROWS, 0:64]         # (64, 64)
    wa1 = p_ref[WA1_ROW:WA1_ROW + WA1_ROWS, 0:64]     # (64, 64)
    wa2 = p_ref[WA2_ROW:WA2_ROW + WA2_ROWS, :]        # (64, 128)
    bi = p_ref[BI_ROW:BI_ROW + 1, 0:64]               # (1, 64)
    ba1 = p_ref[BA1_ROW:BA1_ROW + 1, 0:64]            # (1, 64)
    ba2 = p_ref[BA2_ROW:BA2_ROW + 1, :]               # (1, 128)

    agent = agent_ref[...]                            # (bt, 16)
    lm = lm_ref[...]                                  # (bt*L, 16)
    mask = lm[:, 13:14].reshape(bt, L, 1)             # (bt, L, 1)

    # Fused agent/landmark MLPs: one row-stacked activation, two matmuls.
    # Biases ride through the carried ones-lanes baked into the packed weights.
    x1 = jnp.concatenate([agent, lm], axis=0)                          # (bt*(1+L), 16)
    h1 = relu(jnp.dot(x1, w1f, preferred_element_type=f32))            # (bt*(1+L), 128)
    h2 = relu(jnp.dot(h1, w2f, preferred_element_type=f32))            # (bt*(1+L), 64)
    # agent rows -> [ape | ape], landmark rows -> [0 | le]  (32 lanes per half)
    ape2 = h2[:bt, :]                                                  # (bt, 64)
    le2 = h2[bt:, :].reshape(bt, L, 64)                                # (bt, L, 64)

    # attention logits on the VPU (mul) + lane reduce; /4 folded into *0.25
    logits = jnp.sum(ape2[:, None, :] * le2, axis=-1, keepdims=True) * 0.25   # (bt, L, 1)
    logits = jnp.where(mask == 0.0, NEG_FILL, logits)

    # softmax over landmarks (sublane reduces), reciprocal on the EUP
    m = jnp.max(logits, axis=1, keepdims=True)                         # (bt, 1, 1)
    e = jnp.exp(logits - m)
    s = jnp.sum(e, axis=1, keepdims=True)
    att = e * pl.reciprocal(s, approx=False)                           # (bt, L, 1)

    # attended landmark embedding lands in lanes 32:63
    le_att = relu(jnp.sum(att * le2, axis=1))                          # (bt, 64) = [0 | le_att]

    # info_fc1 as a single matmul: lanes 0:31 = ape, lanes 32:63 = le_att
    lane = jax.lax.broadcasted_iota(jnp.int32, ape2.shape, 1)
    x_info = jnp.where(lane < 32, ape2, 0.0) + le_att                  # (bt, 64)
    info = relu(jnp.dot(x_info, wi, preferred_element_type=f32) + bi)  # (bt, 64)

    # action head
    a = jnp.tanh(jnp.dot(info, wa1, preferred_element_type=f32) + ba1)  # (bt, 64)
    a = jnp.tanh(jnp.dot(a, wa2, preferred_element_type=f32) + ba2)     # (bt, 128), lanes 0:1 valid

    # scaled_action = [(1 + a0) * 15.1, a1 * pi], vectorized over rows, zero elsewhere
    col = jax.lax.broadcasted_iota(jnp.int32, a.shape, 1)
    offset = jnp.where(col == 0, 1.0, 0.0).astype(f32)
    scale = jnp.where(col == 0, 15.1, jnp.where(col == 1, math.pi, 0.0)).astype(f32)
    out_ref[...] = (a + offset) * scale


# ---------------------------------------------------------------------------
# parameter construction / packing (wrapper side, done once)
# ---------------------------------------------------------------------------
def make_params(key, policy_dim: int = 2):
    """nn.Linear-style init; W stored as (in_features, out_features), b as (out,)."""
    def linear(k, in_f, out_f):
        kw, kb = jax.random.split(k)
        bound = 1.0 / math.sqrt(in_f)
        w = jax.random.uniform(kw, (in_f, out_f), jnp.float32, -bound, bound)
        b = jax.random.uniform(kb, (out_f,), jnp.float32, -bound, bound)
        return w, b

    ks = jax.random.split(key, 7)
    return {
        "agent_fc1": linear(ks[0], 3, 32),
        "agent_fc2": linear(ks[1], 32, 32),
        "landmark_fc1": linear(ks[2], 4, 64),
        "landmark_fc2": linear(ks[3], 64, 32),
        "info_fc1": linear(ks[4], 64, 64),
        "action_fc1": linear(ks[5], 64, 64),
        "action_fc2": linear(ks[6], 64, policy_dim),
    }


def pack_params(params):
    """Pack all weights AND biases into one (P_ROWS, 128) f32 buffer (single DMA).

    Fused layer 1 (rows 0:16, 128 output lanes):
      rows 0:3  = agent_fc1 W|b   -> out lanes 64:96, ones carried to lane 127
      rows 8:13 = landmark_fc1 W|b -> out lanes 0:64, ones carried to lane 126
      (row 13 is the mask lane and stays zero)
    Fused layer 2 (rows 16:144, 64 output lanes):
      rows 0:64  = landmark_fc2 W -> out lanes 32:64
      rows 64:96 = agent_fc2 W    -> out lanes 0:32 AND 32:64 (duplicated so the
                   attention dot(ape, le) is a plain lane-aligned multiply+reduce)
      rows 126/127 = landmark/agent biases, driven by the carried ones-lanes.
    """
    w_a1, b_a1 = params["agent_fc1"]
    w_a2, b_a2 = params["agent_fc2"]
    w_l1, b_l1 = params["landmark_fc1"]
    w_l2, b_l2 = params["landmark_fc2"]
    w_i, b_i = params["info_fc1"]
    w_q1, b_q1 = params["action_fc1"]
    w_q2, b_q2 = params["action_fc2"]
    pol = w_q2.shape[1]

    p = jnp.zeros((P_ROWS, 128), jnp.float32)
    # fused layer 1
    p = p.at[W1F_ROW + 0:W1F_ROW + 3, 64:96].set(w_a1)
    p = p.at[W1F_ROW + 3, 64:96].set(b_a1)
    p = p.at[W1F_ROW + 3, 127].set(1.0)
    p = p.at[W1F_ROW + 8:W1F_ROW + 12, 0:64].set(w_l1)
    p = p.at[W1F_ROW + 12, 0:64].set(b_l1)
    p = p.at[W1F_ROW + 12, 126].set(1.0)
    # fused layer 2
    p = p.at[W2F_ROW + 0:W2F_ROW + 64, 32:64].set(w_l2)
    p = p.at[W2F_ROW + 64:W2F_ROW + 96, 0:32].set(w_a2)
    p = p.at[W2F_ROW + 64:W2F_ROW + 96, 32:64].set(w_a2)
    p = p.at[W2F_ROW + 126, 32:64].set(b_l2)
    p = p.at[W2F_ROW + 127, 0:32].set(b_a2)
    p = p.at[W2F_ROW + 127, 32:64].set(b_a2)
    # info / action heads
    p = p.at[WI_ROW:WI_ROW + 64, 0:64].set(w_i)
    p = p.at[WA1_ROW:WA1_ROW + 64, 0:64].set(w_q1)
    p = p.at[WA2_ROW:WA2_ROW + 64, 0:pol].set(w_q2)
    p = p.at[BI_ROW, 0:64].set(b_i)
    p = p.at[BA1_ROW, 0:64].set(b_q1)
    p = p.at[BA2_ROW, 0:pol].set(b_q2)
    return p


# ---------------------------------------------------------------------------
# forward wrapper
# ---------------------------------------------------------------------------
def _round_up(x, m):
    return ((x + m - 1) // m) * m


@partial(jax.jit, static_argnames=("block_b",))
def policy_net_att_forward(observation, packed_params, *, block_b=128):
    """observation: (obs_dim,) or (B, obs_dim). Returns (2,) or (B, 2)."""
    assert block_b % 8 == 0
    squeeze = observation.ndim == 1
    obs = observation[None, :] if squeeze else observation
    obs = obs.astype(jnp.float32)
    B, D = obs.shape
    assert (D - 3) % 5 == 0
    L = (D - 3) // 5

    bt = min(block_b, _round_up(B, 8))
    Bp = _round_up(B, bt)
    if Bp != B:
        obs = jnp.concatenate([obs, jnp.zeros((Bp - B, D), jnp.float32)], axis=0)

    f32 = jnp.float32
    pos = obs[:, :3]
    info = obs[:, 3:3 + 2 * L].reshape(Bp, L, 2)
    est = obs[:, 3 + 2 * L:3 + 4 * L].reshape(Bp, L, 2)
    msk = obs[:, 3 + 4 * L:3 + 5 * L].reshape(Bp, L, 1)

    # agent rows: [x, y, z, 1, 0...0]  (features feed fused-W1 rows 0:3)
    agent_in = jnp.concatenate(
        [pos, jnp.ones((Bp, 1), f32), jnp.zeros((Bp, 12), f32)], axis=1)        # (Bp, 16)
    # landmark rows: [0..0, est_x, est_y, info_x, info_y, 1, mask, 0, 0] (rows 8:13)
    lm_in = jnp.concatenate(
        [jnp.zeros((Bp, L, 8), f32), est, info, jnp.ones((Bp, L, 1), f32), msk,
         jnp.zeros((Bp, L, 2), f32)], axis=2).reshape(Bp * L, 16)               # (Bp*L, 16)

    out = pl.pallas_call(
        partial(policy_net_att_kernel, bt=bt, num_landmark=L),
        out_shape=jax.ShapeDtypeStruct((Bp, 128), jnp.float32),
        grid=(Bp // bt,),
        in_specs=[
            pl.BlockSpec((bt, 16), lambda i: (i, 0)),
            pl.BlockSpec((bt * L, 16), lambda i: (i, 0)),
            pl.BlockSpec((P_ROWS, 128), lambda i: (0, 0)),   # weights stay VMEM-resident
        ],
        out_specs=pl.BlockSpec((bt, 128), lambda i: (i, 0)),
        compiler_params=pltpu.CompilerParams(dimension_semantics=("parallel",)),
    )(agent_in, lm_in, packed_params)

    actions = out[:B, :2]
    return actions[0] if squeeze else actions


# ---------------------------------------------------------------------------
# pure-JAX reference (mirrors the torch module) for the correctness check
# ---------------------------------------------------------------------------
def policy_net_att_reference(observation, params, num_landmark):
    L = num_landmark
    obs = observation[None, :] if observation.ndim == 1 else observation
    relu = jax.nn.relu
    w1, b1 = params["agent_fc1"]; w2, b2 = params["agent_fc2"]
    wl1, bl1 = params["landmark_fc1"]; wl2, bl2 = params["landmark_fc2"]
    wi, bi = params["info_fc1"]
    wa1, ba1 = params["action_fc1"]; wa2, ba2 = params["action_fc2"]

    ape = relu(relu(obs[:, :3] @ w1 + b1) @ w2 + b2)                        # (1, 32)
    info_vec = obs[:, 3:3 + 2 * L]
    est = obs[:, 3 + 2 * L:3 + 4 * L]
    lmk = jnp.concatenate([est.reshape(-1, L, 2), info_vec.reshape(-1, L, 2)], axis=2)
    le = relu(relu(lmk @ wl1 + bl1) @ wl2 + bl2)                            # (1, L, 32)
    mask = obs[:, 3 + 4 * L:][:, None, :]                                   # (1, 1, L)
    logits = jnp.einsum("bd,bld->bl", ape, le)[:, None, :] / 4.0
    logits = jnp.where(mask == 0, NEG_FILL, logits)
    att = jax.nn.softmax(logits, axis=2)
    le_att = relu(jnp.einsum("bkl,bld->bd", att, le))                       # (1, 32)
    info_emb = relu(jnp.concatenate([ape, le_att], axis=1) @ wi + bi)
    a = jnp.tanh(jnp.tanh(info_emb @ wa1 + ba1) @ wa2 + ba2).reshape(-1)
    return jnp.stack([(1.0 + a[0]) * 15.1, a[1] * jnp.pi])


if __name__ == "__main__":
    num_landmark = 8
    input_dim = 3 + 5 * num_landmark   # 43
    batch = 16

    key = jax.random.PRNGKey(0)
    k_obs, k_params, k_mask = jax.random.split(key, 3)

    params = make_params(k_params)
    packed = pack_params(params)

    obs = jax.random.normal(k_obs, (batch, input_dim), dtype=jnp.float32)
    mask_vals = (jax.random.uniform(k_mask, (batch, num_landmark)) > 0.3).astype(jnp.float32)
    obs = obs.at[:, -num_landmark:].set(mask_vals)

    # batched path: grid of 2 steps x 8 observations, weights VMEM-resident
    actions = policy_net_att_forward(obs, packed, block_b=8)
    jax.block_until_ready(actions)
    assert actions.shape == (batch, 2)

    ref = jnp.stack([policy_net_att_reference(obs[b], params, num_landmark)
                     for b in range(batch)])
    assert jnp.allclose(actions, ref, rtol=5e-3, atol=5e-3), (actions, ref)

    # single 1-D observation path mirrors the torch flatten + hstack exactly
    single = policy_net_att_forward(obs[0], packed)
    jax.block_until_ready(single)
    assert single.shape == (2,)
    assert jnp.allclose(single, ref[0], rtol=5e-3, atol=5e-3), (single, ref[0])

    print("KERNEL_OK")
</pallas_src>

<mosaic_0001>
module attributes {stable_mosaic.version = 11 : i64} {
  func.func @policy_net_att_kernel(%arg0: i32, %arg1: memref<8x16xf32, #tpu.memory_space<vmem>>, %arg2: memref<64x16xf32, #tpu.memory_space<vmem>>, %arg3: memref<360x128xf32, #tpu.memory_space<vmem>>, %arg4: memref<8x128xf32, #tpu.memory_space<vmem>>) attributes {dimension_semantics = [#tpu.dimension_semantics<parallel>], iteration_bounds = array<i64: 2>, scalar_prefetch = 0 : i64, scratch_operands = 0 : i64, tpu.core_type = #tpu.core_type<tc>, window_params = [{transform_indices = @transform_0, window_bounds = array<i64: 8, 16>}, {transform_indices = @transform_1, window_bounds = array<i64: 64, 16>}, {pipeline_mode = #tpu.pipeline_mode<synchronous>, transform_indices = @transform_2, window_bounds = array<i64: 360, 128>}, {transform_indices = @transform_3, window_bounds = array<i64: 8, 128>}]} {
    %c0 = arith.constant 0 : index
    %c0_0 = arith.constant 0 : index
    %0 = vector.load %arg3[%c0, %c0_0] : memref<360x128xf32, #tpu.memory_space<vmem>>, vector<16x128xf32>
    %c16 = arith.constant 16 : index
    %c0_1 = arith.constant 0 : index
    %1 = vector.load %arg3[%c16, %c0_1] : memref<360x128xf32, #tpu.memory_space<vmem>>, vector<128x64xf32>
    %c144 = arith.constant 144 : index
    %c0_2 = arith.constant 0 : index
    %2 = vector.load %arg3[%c144, %c0_2] : memref<360x128xf32, #tpu.memory_space<vmem>>, vector<64x64xf32>
    %c208 = arith.constant 208 : index
    %c0_3 = arith.constant 0 : index
    %3 = vector.load %arg3[%c208, %c0_3] : memref<360x128xf32, #tpu.memory_space<vmem>>, vector<64x64xf32>
    %c272 = arith.constant 272 : index
    %c0_4 = arith.constant 0 : index
    %4 = vector.load %arg3[%c272, %c0_4] : memref<360x128xf32, #tpu.memory_space<vmem>>, vector<64x128xf32>
    %c336 = arith.constant 336 : index
    %c0_5 = arith.constant 0 : index
    %5 = vector.load %arg3[%c336, %c0_5] : memref<360x128xf32, #tpu.memory_space<vmem>>, vector<1x64xf32>
    %c344 = arith.constant 344 : index
    %c0_6 = arith.constant 0 : index
    %6 = vector.load %arg3[%c344, %c0_6] : memref<360x128xf32, #tpu.memory_space<vmem>>, vector<1x64xf32>
    %c352 = arith.constant 352 : index
    %c0_7 = arith.constant 0 : index
    %7 = vector.load %arg3[%c352, %c0_7] : memref<360x128xf32, #tpu.memory_space<vmem>>, vector<1x128xf32>
    %c0_8 = arith.constant 0 : index
    %c0_9 = arith.constant 0 : index
    %8 = vector.load %arg1[%c0_8, %c0_9] : memref<8x16xf32, #tpu.memory_space<vmem>>, vector<8x16xf32>
    %c0_10 = arith.constant 0 : index
    %c0_11 = arith.constant 0 : index
    %9 = vector.load %arg2[%c0_10, %c0_11] : memref<64x16xf32, #tpu.memory_space<vmem>>, vector<64x16xf32>
    %10 = vector.extract_strided_slice %9 {offsets = [0, 13], sizes = [64, 1], strides = [1, 1]} : vector<64x16xf32> to vector<64x1xf32>
    %11 = vector.shape_cast %10 : vector<64x1xf32> to vector<8x8x1xf32>
    %12 = tpu.concatenate %8, %9 in 0 : vector<8x16xf32>, vector<64x16xf32> -> vector<72x16xf32>
    %cst = arith.constant dense<0.000000e+00> : vector<72x128xf32>
    %13 = tpu.matmul %12, %0, %cst {dimension_numbers = #tpu.dot_dimension_numbers<[1], [0], [0], [1], [0, 0, 1, 1], [], []>} : vector<72x16xf32>, vector<16x128xf32>, vector<72x128xf32> -> vector<72x128xf32>
    %cst_12 = arith.constant 0.000000e+00 : f32
    %14 = vector.broadcast %cst_12 : f32 to vector<72x128xf32>
    %15 = arith.maximumf %13, %14 : vector<72x128xf32>
    %cst_13 = arith.constant dense<0.000000e+00> : vector<72x64xf32>
    %16 = tpu.matmul %15, %1, %cst_13 {dimension_numbers = #tpu.dot_dimension_numbers<[1], [0], [0], [1], [0, 0, 1, 1], [], []>} : vector<72x128xf32>, vector<128x64xf32>, vector<72x64xf32> -> vector<72x64xf32>
    %cst_14 = arith.constant 0.000000e+00 : f32
    %17 = vector.broadcast %cst_14 : f32 to vector<72x64xf32>
    %18 = arith.maximumf %16, %17 : vector<72x64xf32>
    %19 = vector.extract_strided_slice %18 {offsets = [0, 0], sizes = [8, 64], strides = [1, 1]} : vector<72x64xf32> to vector<8x64xf32>
    %20 = vector.extract_strided_slice %18 {offsets = [8, 0], sizes = [64, 64], strides = [1, 1]} : vector<72x64xf32> to vector<64x64xf32>
    %21 = vector.shape_cast %20 : vector<64x64xf32> to vector<8x8x64xf32>
    %22 = vector.shape_cast %19 : vector<8x64xf32> to vector<8x1x64xf32>
    %23 = vector.broadcast %22 : vector<8x1x64xf32> to vector<8x8x64xf32>
    %24 = arith.mulf %23, %21 : vector<8x8x64xf32>
    %cst_15 = arith.constant dense<0.000000e+00> : vector<8x8xf32>
    %25 = vector.multi_reduction <add>, %24, %cst_15 [2] : vector<8x8x64xf32> to vector<8x8xf32>
    %26 = vector.shape_cast %25 : vector<8x8xf32> to vector<8x8x1xf32>
    %cst_16 = arith.constant 2.500000e-01 : f32
    %27 = vector.broadcast %cst_16 : f32 to vector<8x8x1xf32>
    %28 = arith.mulf %26, %27 : vector<8x8x1xf32>
    %cst_17 = arith.constant 0.000000e+00 : f32
    %29 = vector.broadcast %cst_17 : f32 to vector<8x8x1xf32>
    %30 = arith.cmpf oeq, %11, %29 : vector<8x8x1xf32>
    %cst_18 = arith.constant -1.000000e+10 : f32
    %31 = vector.broadcast %cst_18 : f32 to vector<8x8x1xf32>
    %32 = arith.select %30, %31, %28 : vector<8x8x1xi1>, vector<8x8x1xf32>
    %cst_19 = arith.constant dense<0xFF800000> : vector<8x1xf32>
    %33 = vector.multi_reduction <maximumf>, %32, %cst_19 [1] : vector<8x8x1xf32> to vector<8x1xf32>
    %34 = vector.shape_cast %33 : vector<8x1xf32> to vector<8x1x1xf32>
    %35 = vector.broadcast %34 : vector<8x1x1xf32> to vector<8x8x1xf32>
    %36 = arith.subf %32, %35 : vector<8x8x1xf32>
    %37 = math.exp %36 : vector<8x8x1xf32>
    %cst_20 = arith.constant dense<0.000000e+00> : vector<8x1xf32>
    %38 = vector.multi_reduction <add>, %37, %cst_20 [1] : vector<8x8x1xf32> to vector<8x1xf32>
    %39 = vector.shape_cast %38 : vector<8x1xf32> to vector<8x1x1xf32>
    %40 = tpu.reciprocal %39 : vector<8x1x1xf32> -> vector<8x1x1xf32>
    %41 = vector.broadcast %40 : vector<8x1x1xf32> to vector<8x8x1xf32>
    %42 = arith.mulf %37, %41 : vector<8x8x1xf32>
    %43 = vector.broadcast %42 : vector<8x8x1xf32> to vector<8x8x64xf32>
    %44 = arith.mulf %43, %21 : vector<8x8x64xf32>
    %cst_21 = arith.constant dense<0.000000e+00> : vector<8x64xf32>
    %45 = vector.multi_reduction <add>, %44, %cst_21 [1] : vector<8x8x64xf32> to vector<8x64xf32>
    %cst_22 = arith.constant 0.000000e+00 : f32
    %46 = vector.broadcast %cst_22 : f32 to vector<8x64xf32>
    %47 = arith.maximumf %45, %46 : vector<8x64xf32>
    %48 = tpu.iota {dimensions = array<i32: 1>} : vector<8x64xi32>
    %c32_i32 = arith.constant 32 : i32
    %49 = vector.broadcast %c32_i32 : i32 to vector<8x64xi32>
    %50 = arith.cmpi slt, %48, %49 : vector<8x64xi32>
    %cst_23 = arith.constant 0.000000e+00 : f32
    %51 = vector.broadcast %cst_23 : f32 to vector<8x64xf32>
    %52 = arith.select %50, %19, %51 : vector<8x64xi1>, vector<8x64xf32>
    %53 = arith.addf %52, %47 : vector<8x64xf32>
    %cst_24 = arith.constant dense<0.000000e+00> : vector<8x64xf32>
    %54 = tpu.matmul %53, %2, %cst_24 {dimension_numbers = #tpu.dot_dimension_numbers<[1], [0], [0], [1], [0, 0, 1, 1], [], []>} : vector<8x64xf32>, vector<64x64xf32>, vector<8x64xf32> -> vector<8x64xf32>
    %55 = vector.broadcast %5 : vector<1x64xf32> to vector<8x64xf32>
    %56 = arith.addf %54, %55 : vector<8x64xf32>
    %cst_25 = arith.constant 0.000000e+00 : f32
    %57 = vector.broadcast %cst_25 : f32 to vector<8x64xf32>
    %58 = arith.maximumf %56, %57 : vector<8x64xf32>
    %cst_26 = arith.constant dense<0.000000e+00> : vector<8x64xf32>
    %59 = tpu.matmul %58, %3, %cst_26 {dimension_numbers = #tpu.dot_dimension_numbers<[1], [0], [0], [1], [0, 0, 1, 1], [], []>} : vector<8x64xf32>, vector<64x64xf32>, vector<8x64xf32> -> vector<8x64xf32>
    %60 = vector.broadcast %6 : vector<1x64xf32> to vector<8x64xf32>
    %61 = arith.addf %59, %60 : vector<8x64xf32>
    %62 = math.tanh %61 : vector<8x64xf32>
    %cst_27 = arith.constant dense<0.000000e+00> : vector<8x128xf32>
    %63 = tpu.matmul %62, %4, %cst_27 {dimension_numbers = #tpu.dot_dimension_numbers<[1], [0], [0], [1], [0, 0, 1, 1], [], []>} : vector<8x64xf32>, vector<64x128xf32>, vector<8x128xf32> -> vector<8x128xf32>
    %64 = vector.broadcast %7 : vector<1x128xf32> to vector<8x128xf32>
    %65 = arith.addf %63, %64 : vector<8x128xf32>
    %66 = math.tanh %65 : vector<8x128xf32>
    %67 = tpu.iota {dimensions = array<i32: 1>} : vector<8x128xi32>
    %c0_i32 = arith.constant 0 : i32
    %68 = vector.broadcast %c0_i32 : i32 to vector<8x128xi32>
    %69 = arith.cmpi eq, %67, %68 : vector<8x128xi32>
    %cst_28 = arith.constant 1.000000e+00 : f32
    %cst_29 = arith.constant 0.000000e+00 : f32
    %70 = vector.broadcast %cst_28 : f32 to vector<8x128xf32>
    %71 = vector.broadcast %cst_29 : f32 to vector<8x128xf32>
    %72 = arith.select %69, %70, %71 : vector<8x128xi1>, vector<8x128xf32>
    %c0_i32_30 = arith.constant 0 : i32
    %73 = vector.broadcast %c0_i32_30 : i32 to vector<8x128xi32>
    %74 = arith.cmpi eq, %67, %73 : vector<8x128xi32>
    %c1_i32 = arith.constant 1 : i32
    %75 = vector.broadcast %c1_i32 : i32 to vector<8x128xi32>
    %76 = arith.cmpi eq, %67, %75 : vector<8x128xi32>
    %cst_31 = arith.constant 3.14159274 : f32
    %cst_32 = arith.constant 0.000000e+00 : f32
    %77 = vector.broadcast %cst_31 : f32 to vector<8x128xf32>
    %78 = vector.broadcast %cst_32 : f32 to vector<8x128xf32>
    %79 = arith.select %76, %77, %78 : vector<8x128xi1>, vector<8x128xf32>
    %cst_33 = arith.constant 1.510000e+01 : f32
    %80 = vector.broadcast %cst_33 : f32 to vector<8x128xf32>
    %81 = arith.select %74, %80, %79 : vector<8x128xi1>, vector<8x128xf32>
    %82 = arith.addf %66, %72 : vector<8x128xf32>
    %83 = arith.mulf %82, %81 : vector<8x128xf32>
    %c0_34 = arith.constant 0 : index
    %c0_35 = arith.constant 0 : index
    %84 = vector.load %arg4[%c0_34, %c0_35] : memref<8x128xf32, #tpu.memory_space<vmem>>, vector<8x128xf32>
    tpu.vector_store %arg4[%c0_34, %c0_35], %83 {strides = array<i32>} : memref<8x128xf32, #tpu.memory_space<vmem>>, vector<8x128xf32>,
    return
  }
  func.func @transform_0(%arg0: i32) -> (i32, i32) {
    %c0_i32 = arith.constant 0 : i32
    %c0_i32_0 = arith.constant 0 : i32
    return %arg0, %c0_i32 : i32, i32
  }
  func.func @transform_1(%arg0: i32) -> (i32, i32) {
    %c0_i32 = arith.constant 0 : i32
    %c0_i32_0 = arith.constant 0 : i32
    return %arg0, %c0_i32 : i32, i32
  }
  func.func @transform_2(%arg0: i32) -> (i32, i32) {
    %c0_i32 = arith.constant 0 : i32
    %c0_i32_0 = arith.constant 0 : i32
    %c0_i32_1 = arith.constant 0 : i32
    return %c0_i32, %c0_i32_0 : i32, i32
  }
  func.func @transform_3(%arg0: i32) -> (i32, i32) {
    %c0_i32 = arith.constant 0 : i32
    %c0_i32_0 = arith.constant 0 : i32
    return %arg0, %c0_i32 : i32, i32
  }
}

</mosaic_0001>

<bundles_post_ra>
// kernel: policy_net_att_forward.1
= control target key start
LH: loop header
LB: loop body
LE: loop exit
PB: predicated region body
PF: predicated region fallthrough
CT: control target
= control target key end

     0   :  { %s1638_s12 = smov 0   ;;  %s2051_s0 = inlined_call_operand.vmem [shape: f32[16,16], index: 0, kind: input, shape index: {}]   ;;  %s2052_s1 = inlined_call_operand.vmem [shape: f32[128,16], index: 1, kind: input, shape index: {}]   ;;  %s2053_s2 = inlined_call_operand.vmem [shape: f32[360,128], index: 2, kind: input, shape index: {}]   ;;  %s2054_s3 = inlined_call_operand.vmem [shape: f32[16,128], index: 3, kind: output, shape index: {}]  }
   0x1 LB: > { %s1644_s13 = sadd.s32 4294967295, %s1611_s12   ;;  %p1259_p0 = scmp.ge.s32.totalorder %s1611_s12, 1  ;;  %s1611_s12 = sphi %s1638_s12, %s13_s12  }
   0x2   : > { %p147_p1 = scmp.lt.s32.totalorder %s1611_s12, 3 }
   0x4   : > { %p148_p2 = pnand %p1259_p0, %p147_p1 }
   0x5   : > { %v188_v0 = vld [vmem:[%s2053_s2] sm:$0xff] (!%p148_p2)  ;;  %v189_v1 = vld [vmem:[%s2053_s2 + $0x8] sm:$0xff] (!%p148_p2)  ;;  %p174_p3 = scmp.lt.s32.totalorder (!%p148_p2), %s1644_s13, 1  ;;  %v1613_v2 = vmov (!%p148_p2), 0.0|0.0   ;;  %vm1614_vm0 = vmmov (!%p148_p2), 0   ;;  %v1615_v4 = vmov (!%p148_p2), 0.0  }
   0x6   : > { %151 = sbr.rel (%p148_p2) target bundleno = 1501 (0x5dd), region = 32  ;;  %1491 = vmatprep.subr.bf16.mxu0 (!%p148_p2), %v1613_v2  ;;  %v1492_v3 = vpack.c.bf16 (!%p148_p2), %v189_v1, %v188_v0  ;;  %1348 = vmatprep.mubr.msk.f32.mxu0 (!%p148_p2), %vm1614_vm0, %v1615_v4  ;;  %s1261_s18 = sshll.u32 (!%p148_p2), %s1644_s13, 3  ;;  %v190_v5 = vld [vmem:[%s2053_s2 + $0x10] sm:$0xff] (!%p148_p2)  ;;  %v191_v6 = vld [vmem:[%s2053_s2 + $0x18] sm:$0xff] (!%p148_p2)  ;;  %v192_v7 = vld [vmem:[%s2053_s2 + $0x20] sm:$0xff] (!%p148_p2)  ;;  %vm242_vm1 = vcmask (!%p148_p2), 130048  }
   0x7   : > { %1494 = vmatprep.subr.bf16.mxu1 (!%p148_p2), %v1613_v2  ;;  %v1495_v8 = vpack.c.bf16 (!%p148_p2), %v191_v6, %v190_v5  ;;  %v193_v9 = vld [vmem:[%s2053_s2 + $0x28] sm:$0xff] (!%p148_p2)  ;;  %1407 = vmatprep.mubr.msk.f32.mxu1 (!%p148_p2), %vm1614_vm0, %v1615_v4  ;;  %p179_p4 = scmp.lt.s32.totalorder (!%p148_p2), %s1261_s18, 15  ;;  %v194_v11 = vld [vmem:[%s2053_s2 + $0x30] sm:$0xff] (!%p148_p2)  ;;  %v195_v12 = vld [vmem:[%s2053_s2 + $0x38] sm:$0xff] (!%p148_p2)  ;;  %v1616_v1 = vmov (!%p148_p2), 1966171168   ;;  %v513_v5 = vlaneseq (!%p148_p2) }
   0x8   : > { %1493 = vmatpush3.bf16.msra.mxu0 (!%p148_p2), %v1492_v3  ;;  %v1498_v10 = vpack.c.bf16 (!%p148_p2), %v193_v9, %v192_v7  ;;  %v1501_v14 = vpack.c.bf16 (!%p148_p2), %v195_v12, %v194_v11  ;;  %v196_v15 = vld [vmem:[%s2053_s2 + $0x40] sm:$0xff] (!%p148_p2)  ;;  %v197_v16 = vld [vmem:[%s2053_s2 + $0x48] sm:$0xff] (!%p148_p2)  ;;  %v198_v20 = vld [vmem:[%s2053_s2 + $0x50] sm:$0xff] (!%p148_p2)  ;;  %v511_v3 = vunpack.c.l.s4 (!%p148_p2), %v1616_v1  ;;  %vm606_vm2 = vcmask (!%p148_p2), 523264  }
   0x9   : > { %1496 = vmatpush3.bf16.msra.mxu1 (!%p148_p2), %v1495_v8  ;;  %1518 = vmatprep.subr.bf16.mxu0 (!%p148_p2), %v1613_v2  ;;  %v1504_v19 = vpack.c.bf16 (!%p148_p2), %v197_v16, %v196_v15  ;;  %v199_v21 = vld [vmem:[%s2053_s2 + $0x58] sm:$0xff] (!%p148_p2)  ;;  %v200_v24 = vld [vmem:[%s2053_s2 + $0x60] sm:$0xff] (!%p148_p2)  ;;  %v201_v25 = vld [vmem:[%s2053_s2 + $0x68] sm:$0xff] (!%p148_p2)  ;;  %v514_v7 = vshrl.u32 (!%p148_p2), %v513_v5, 7  ;;  %vm655_vm4 = vcmask (!%p148_p2), 113768   ;;  %vm932_vm12 = vcmask (!%p148_p2), 1041409  }
   0xa   : > { %1497 = vmatprep.subr.bf16.mxu1 (!%p148_p2), %v1613_v2  ;;  %v1507_v23 = vpack.c.bf16 (!%p148_p2), %v199_v21, %v198_v20  ;;  %v1510_v27 = vpack.c.bf16 (!%p148_p2), %v201_v25, %v200_v24  ;;  %v202_v28 = vld [vmem:[%s2053_s2 + $0x70] sm:$0xff] (!%p148_p2)  ;;  %v203_v29 = vld [vmem:[%s2053_s2 + $0x78] sm:$0xff] (!%p148_p2)  ;;  %v204_v35 = vld [vmem:[%s2053_s2 + $0x80] sm:$0xff] (!%p148_p2)  ;;  %v512_v6 = vunpack.c.0.s8 (!%p148_p2), %v511_v3  ;;  %vm934_vm13 = vcmask (!%p148_p2), 1042434  }
   0xb   : > { %v1513_v31 = vpack.c.bf16 (!%p148_p2), %v203_v29, %v202_v28  ;;  %v205_v36 = vld [vmem:[%s2053_s2 + $0x88] sm:$0xff] (!%p148_p2)  ;;  %vm936_vm14 = vcmask (!%p148_p2), 1043459   ;;  %vm938_vm15 = vcmask (!%p148_p2), 1044484  }
   0xc   : > { %v1516_v37 = vpack.c.bf16 (!%p148_p2), %v205_v36, %v204_v35  ;;  %v515_v8 = vsub.s32 (!%p148_p2), %v512_v6, %v514_v7 }
   0xd   : > { %s2056_s13 = smov (!%p174_p3, %s1644_s13), 1  ;;  %s2058_s18 = smov (!%p179_p4, %s1261_s18), 15  ;;  %1499 = vmatpush3.bf16.msra.mxu1 %v1498_v10 }
   0xe   : > { %s1260_s27 = sshll.u32 %s2056_s13, 3  ;;  %s1262_s8 = sshll.u32 %s2058_s18, 3  ;;  %1500 = vmatprep.subr.bf16.mxu1 %v1613_v2 }
   0xf   : > { %s177_s30 = scalar_lea.vmem %s2051_s0, %s1260_s27  ;;  %s1697_s11 = scalar_lea.vmem %s2052_s1, %s1262_s8 }
  0x10   : > { %v233_v13 = vld [vmem:[%s177_s30] sm:$0xff]  ;;  %v1714_v18 = vld [vmem:[%s1697_s11 + $0x8] sm:$0xff]  ;;  %v1728_v22 = vld [vmem:[%s1697_s11 + $0x10] sm:$0xff]  ;;  %s187_s18 = scalar_lea.vmem %s2054_s3, %s1260_s27 }
  0x11   : > { %1349 = vmatmul.mubr.msk.f32.vlgmr.msra.gmra.mrb[0].mxu0 %vm242_vm1, %v233_v13  ;;  %v1707_v17 = vld [vmem:[%s1697_s11] sm:$0xff]  ;;  %1502 = vmatpush3.bf16.msra.mxu1 %v1501_v14  ;;  %v1742_v26 = vld [vmem:[%s1697_s11 + $0x18] sm:$0xff]  ;;  %v1764_v32 = vld [vmem:[%s1697_s11 + $0x28] sm:$0xff]  ;;  %v1814_v13 = vsub.s32 0, %v514_v7  ;;  %vm640_vm5 = vcmp.eq.f32.partialorder %v1714_v18, 0.0  ;;  %vm641_vm6 = vcmp.eq.f32.partialorder %v1728_v22, 0.0 }
  0x12   : > { %1351 = vmatprep.mubr.msk.f32.mxu0 %vm1614_vm0, %v1615_v4  ;;  %1503 = vmatprep.subr.bf16.mxu1 %v1613_v2  ;;  %v1756_v30 = vld [vmem:[%s1697_s11 + $0x20] sm:$0xff]  ;;  %v1772_v33 = vld [vmem:[%s1697_s11 + $0x30] sm:$0xff]  ;;  %v1779_v34 = vld [vmem:[%s1697_s11 + $0x38] sm:$0xff]  ;;  %vm639_vm3 = vcmp.eq.f32.partialorder %v1707_v17, 0.0  ;;  %vm642_vm7 = vcmp.eq.f32.partialorder %v1742_v26, 0.0  ;;  %vm644_vm9 = vcmp.eq.f32.partialorder %v1764_v32, 0.0 }
  0x13   : > { %vm643_vm8 = vcmp.eq.f32.partialorder %v1756_v30, 0.0  ;;  %vm645_vm10 = vcmp.eq.f32.partialorder %v1772_v33, 0.0  ;;  %vm646_vm11 = vcmp.eq.f32.partialorder %v1779_v34, 0.0 }
  0x15   : > { %1352 = vmatmul.mubr.msk.f32.gmra.mrb[2].mxu0 %vm242_vm1, %v1707_v17  ;;  %1505 = vmatpush3.bf16.msra.mxu1 %v1504_v19 }
  0x16   : > { %1354 = vmatprep.mubr.msk.f32.mxu0 %vm1614_vm0, %v1615_v4  ;;  %1506 = vmatprep.subr.bf16.mxu1 %v1613_v2 }
  0x19   : > { %1355 = vmatmul.mubr.msk.f32.gmra.mrb[4].mxu0 %vm242_vm1, %v1714_v18  ;;  %1508 = vmatpush3.bf16.msra.mxu1 %v1507_v23 }
  0x1a   : > { %1357 = vmatprep.mubr.msk.f32.mxu0 %vm1614_vm0, %v1615_v4  ;;  %1509 = vmatprep.subr.bf16.mxu1 %v1613_v2 }
  0x1d   : > { %1358 = vmatmul.mubr.msk.f32.gmra.mrb[6].mxu0 %vm242_vm1, %v1728_v22  ;;  %1511 = vmatpush3.bf16.msra.mxu1 %v1510_v27 }
  0x1e   : > { %1360 = vmatprep.mubr.msk.f32.mxu0 %vm1614_vm0, %v1615_v4  ;;  %1512 = vmatprep.subr.bf16.mxu1 %v1613_v2 }
  0x21   : > { %1361 = vmatmul.mubr.msk.f32.gmra.mrb[8].mxu0 %vm242_vm1, %v1742_v26  ;;  %1514 = vmatpush3.bf16.msra.mxu1 %v1513_v31 }
  0x22   : > { %1363 = vmatprep.mubr.msk.f32.mxu0 %vm1614_vm0, %v1615_v4  ;;  %1515 = vmatprep.subr.bf16.mxu1 %v1613_v2 }
  0x25   : > { %1364 = vmatmul.mubr.msk.f32.gmra.mrb[10].mxu0 %vm242_vm1, %v1756_v30  ;;  %1517 = vmatpush3.bf16.msra.mxu1 %v1516_v37 }
  0x26   : > { %1366 = vmatprep.mubr.msk.f32.mxu0 %vm1614_vm0, %v1615_v4  ;;  %1542 = vmatprep.subr.bf16.mxu1 %v1613_v2 }
  0x29   : > { %1367 = vmatmul.mubr.msk.f32.gmra.mrb[12].mxu0 %vm242_vm1, %v1764_v32 }
  0x2a   : > { %1369 = vmatprep.mubr.msk.f32.mxu0 %vm1614_vm0, %v1615_v4 }
  0x2d   : > { %1370 = vmatmul.mubr.msk.f32.gmra.mrb[14].mxu0 %vm242_vm1, %v1772_v33 }
  0x2e   : > { %1372 = vmatprep.mubr.msk.f32.mxu0 %vm1614_vm0, %v1615_v4 }
  0x31   : > { %1373 = vmatmul.mubr.msk.f32.gmra.mrb[16].mxu0 %vm242_vm1, %v1779_v34  ;;  %vm940_vm1 = vcmask 1045509  }
  0x32   : > { %1450 = vmatprep.mubr.msk.f32.mxu0 %vm1614_vm0, %v1615_v4 }
  0xe4   : > { %v336_v38 = vpop.f32.mrb[0].mxu0 }
  0xe5   : > { %v380_v39 = vmax.f32 %v336_v38, 0.0  ;;  %v1350_v40 = vpop.f32.mrb[1].mxu0 }
  0xe7   : > { %1408 = vmatmul.mubr.f32.vlgmr.msra.gmra.mrb[0].mxu1 %v380_v39 }
  0xe8   : > { %v341_v41 = vpop.f32.mrb[2].mxu0  ;;  %1410 = vmatprep.mubr.msk.f32.mxu1 %vm1614_vm0, %v1615_v4 }
  0xe9   : > { %v381_v42 = vmax.f32 %v341_v41, 0.0  ;;  %v1353_v43 = vpop.f32.mrb[3].mxu0 }
  0xeb   : > { %1411 = vmatmul.mubr.f32.gmra.mrb[2].mxu1 %v381_v42 }
  0xec   : > { %v346_v44 = vpop.f32.mrb[4].mxu0  ;;  %1413 = vmatprep.mubr.msk.f32.mxu1 %vm1614_vm0, %v1615_v4 }
  0xed   : > { %v382_v45 = vmax.f32 %v346_v44, 0.0  ;;  %v1356_v46 = vpop.f32.mrb[5].mxu0 }
  0xef   : > { %1414 = vmatmul.mubr.f32.gmra.mrb[4].mxu1 %v382_v45 }
  0xf0   : > { %v351_v47 = vpop.f32.mrb[6].mxu0  ;;  %1416 = vmatprep.mubr.msk.f32.mxu1 %vm1614_vm0, %v1615_v4 }
  0xf1   : > { %v383_v48 = vmax.f32 %v351_v47, 0.0  ;;  %v1359_v49 = vpop.f32.mrb[7].mxu0 }
  0xf3   : > { %1417 = vmatmul.mubr.f32.gmra.mrb[6].mxu1 %v383_v48 }
  0xf4   : > { %v356_v50 = vpop.f32.mrb[8].mxu0  ;;  %1419 = vmatprep.mubr.msk.f32.mxu1 %vm1614_vm0, %v1615_v4 }
  0xf5   : > { %v384_v51 = vmax.f32 %v356_v50, 0.0  ;;  %v1362_v52 = vpop.f32.mrb[9].mxu0 }
  0xf7   : > { %1420 = vmatmul.mubr.f32.gmra.mrb[8].mxu1 %v384_v51 }
  0xf8   : > { %v361_v53 = vpop.f32.mrb[10].mxu0  ;;  %1422 = vmatprep.mubr.msk.f32.mxu1 %vm1614_vm0, %v1615_v4 }
  0xf9   : > { %v385_v54 = vmax.f32 %v361_v53, 0.0  ;;  %v1365_v55 = vpop.f32.mrb[11].mxu0 }
  0xfb   : > { %1423 = vmatmul.mubr.f32.gmra.mrb[10].mxu1 %v385_v54 }
  0xfc   : > { %v366_v56 = vpop.f32.mrb[12].mxu0  ;;  %1425 = vmatprep.mubr.msk.f32.mxu1 %vm1614_vm0, %v1615_v4 }
  0xfd   : > { %v386_v57 = vmax.f32 %v366_v56, 0.0  ;;  %v1368_v58 = vpop.f32.mrb[13].mxu0 }
  0xff   : > { %1426 = vmatmul.mubr.f32.gmra.mrb[12].mxu1 %v386_v57 }
 0x100   : > { %v371_v59 = vpop.f32.mrb[14].mxu0  ;;  %1428 = vmatprep.mubr.msk.f32.mxu1 %vm1614_vm0, %v1615_v4 }
 0x101   : > { %v387_v60 = vmax.f32 %v371_v59, 0.0  ;;  %v1371_v61 = vpop.f32.mrb[15].mxu0 }
 0x103   : > { %1429 = vmatmul.mubr.f32.gmra.mrb[14].mxu1 %v387_v60 }
 0x104   : > { %v376_v62 = vpop.f32.mrb[16].mxu0  ;;  %1431 = vmatprep.mubr.msk.f32.mxu1 %vm1614_vm0, %v1615_v4 }
 0x105   : > { %v388_v63 = vmax.f32 %v376_v62, 0.0  ;;  %v1374_v0 = vpop.f32.mrb[17].mxu0 }
 0x107   : > { %1432 = vmatmul.mubr.f32.gmra.mrb[16].mxu1 %v388_v63 }
 0x108   : > { %1488 = vmatprep.mubr.msk.f32.mxu1 %vm1614_vm0, %v1615_v4 }
 0x1ba   : > { %v455_v9 = vpop.f32.mrb[0].mxu1 }
 0x1bb   : > { %v1811_v10 = vmax.f32 %v455_v9, 0.0  ;;  %v1409_v11 = vpop.f32.mrb[1].mxu1 }
 0x1bd   : > { %v516_v12 = vrot.slane %v1811_v10, %v515_v8  ;;  %v509_v24 = vcombine.high %v1811_v10, %v1811_v10 }
 0x1be   : > { %v1816_v14 = vpop.f32.mrb[2].mxu1 }
 0x1bf   : > { %v524_v15 = vcombine.high %v516_v12, %v516_v12  ;;  %v500_v16 = vmax.f32 %v1816_v14, 0.0  ;;  %v1412_v19 = vpop.f32.mrb[3].mxu1  ;;  %v532_v20 = vrot.slane %v516_v12, %v515_v8  ;;  %v523_v38 = vrot.slane %v509_v24, %v515_v8 }
 0x1c1   : > { %v561_v21 = vrot.slane %v532_v20, %v1814_v13  ;;  %v546_v23 = vrot.slane %v524_v15, %v515_v8  ;;  %v554_v35 = vcombine.high %v532_v20, %v532_v20  ;;  %v539_v47 = vrot.slane %v523_v38, %v515_v8 }
 0x1c2   : > { %v1822_v25 = vpop.f32.mrb[4].mxu1  ;;  %v525_v52 = vcombine.high %v523_v38, %v523_v38 }
 0x1c3   : > { %v501_v27 = vmax.f32 %v1822_v25, 0.0  ;;  %v1415_v28 = vpop.f32.mrb[5].mxu1  ;;  %v598_v29 = vmul.f32 %v561_v21, %v500_v16  ;;  %v565_v31 = vrot.slane %v546_v23, %v1814_v13  ;;  %v569_v42 = vrot.slane %v554_v35, %v1814_v13 }
 0x1c4   : > { %v556_v43 = vcombine.high %v546_v23, %v546_v23  ;;  %v577_v58 = vrot.slane %v539_v47, %v1814_v13  ;;  %v553_v59 = vrot.slane %v525_v52, %v515_v8  ;;  %v555_v3 = vcombine.high %v539_v47, %v539_v47 }
 0x1c5   : > { %v607_v36 = vsel %vm606_vm2, %v598_v29, 0.0  ;;  %v599_v37 = vmul.f32 %v565_v31, %v501_v27  ;;  %v1617_v35 = vmov 13  }
 0x1c6   : > { %608 = vadd.xlane.f32.xlu0 %v607_v36  ;;  %v1831_v39 = vpop.f32.mrb[6].mxu1  ;;  %v573_v51 = vrot.slane %v556_v43, %v1814_v13  ;;  %v581_v1 = vrot.slane %v553_v59, %v1814_v13  ;;  %v585_v12 = vrot.slane %v555_v3, %v1814_v13  ;;  %v557_v15 = vcombine.high %v553_v59, %v553_v59 }
 0x1c7   : > { %v502_v40 = vmax.f32 %v1831_v39, 0.0  ;;  %v1418_v41 = vpop.f32.mrb[7].mxu1  ;;  %v610_v44 = vsel %vm606_vm2, %v599_v37, 0.0  ;;  %1567 = vset.pattern.permute.xlu0 %v1617_v35  ;;  %1568 = vset.pattern.permute.xlu1 %v1617_v35 }
 0x1c8   : > { %v589_v28 = vrot.slane %v557_v15, %v1814_v13 }
 0x1c9   : > { %v600_v45 = vmul.f32 %v569_v42, %v502_v40 }
 0x1ca   : > { %611 = vadd.xlane.f32.xlu0 %v610_v44  ;;  %v1838_v46 = vpop.f32.mrb[8].mxu1 }
 0x1cb   : > { %v503_v48 = vmax.f32 %v1838_v46, 0.0  ;;  %v613_v49 = vsel %vm606_vm2, %v600_v45, 0.0  ;;  %v1421_v50 = vpop.f32.mrb[9].mxu1 }
 0x1cc   : > { %614 = vadd.xlane.f32.xlu1 %v613_v49 }
 0x1cd   : > { %v601_v53 = vmul.f32 %v573_v51, %v503_v48 }
 0x1ce   : > { %v1845_v54 = vpop.f32.mrb[10].mxu1 }
 0x1cf   : > { %v504_v55 = vmax.f32 %v1845_v54, 0.0  ;;  %v616_v56 = vsel %vm606_vm2, %v601_v53, 0.0  ;;  %v1424_v57 = vpop.f32.mrb[11].mxu1 }
 0x1d0   : > { %617 = vadd.xlane.f32.xlu1 %v616_v56 }
 0x1d1   : > { %v602_v60 = vmul.f32 %v577_v58, %v504_v55 }
 0x1d2   : > { %v1852_v61 = vpop.f32.mrb[12].mxu1 }
 0x1d3   : > { %v505_v62 = vmax.f32 %v1852_v61, 0.0  ;;  %v619_v63 = vsel %vm606_vm2, %v602_v60, 0.0  ;;  %v1427_v0 = vpop.f32.mrb[13].mxu1 }
 0x1d4   : > { %620 = vadd.xlane.f32.xlu0 %v619_v63 }
 0x1d5   : > { %v603_v6 = vmul.f32 %v581_v1, %v505_v62 }
 0x1d6   : > { %v1859_v7 = vpop.f32.mrb[14].mxu1 }
 0x1d7   : > { %v506_v8 = vmax.f32 %v1859_v7, 0.0  ;;  %v622_v9 = vsel %vm606_vm2, %v603_v6, 0.0  ;;  %v1430_v11 = vpop.f32.mrb[15].mxu1 }
 0x1d8   : > { %623 = vadd.xlane.f32.xlu1 %v622_v9 }
 0x1d9   : > { %v604_v19 = vmul.f32 %v585_v12, %v506_v8 }
 0x1da   : > { %v1866_v20 = vpop.f32.mrb[16].mxu1 }
 0x1db   : > { %v507_v21 = vmax.f32 %v1866_v20, 0.0  ;;  %v625_v23 = vsel %vm606_vm2, %v604_v19, 0.0  ;;  %v1433_v24 = vpop.f32.mrb[17].mxu1 }
 0x1dc   : > { %626 = vadd.xlane.f32.xlu0 %v625_v23 }
 0x1dd   : > { %v605_v29 = vmul.f32 %v589_v28, %v507_v21 }
 0x1df   : > { %v628_v31 = vsel %vm606_vm2, %v605_v29, 0.0 }
 0x1e0   : > { %629 = vadd.xlane.f32.xlu1 %v628_v31 }
 0x253   : > { %v609_v36 = vpop.xlane.xlu0 %608 }
 0x254   : > { %v631_v37 = vmul.f32 0.25, %v609_v36 }
 0x256   : > { %v647_v38 = vsel %vm639_vm3, -1e+10, %v631_v37  ;;  %vm942_vm3 = vcmask 1046534  }
 0x257   : > { %v656_v41 = vsel %vm655_vm4, %v647_v38, -inf  ;;  %v612_v13 = vpop.xlane.xlu0 %611 }
 0x258   : > { %v657_v42 = vrot.slane %v656_v41, 4  ;;  %v632_v43 = vmul.f32 0.25, %v612_v13 }
 0x259   : > { %v615_v44 = vpop.xlane.xlu1 %614 }
 0x25a   : > { %v658_v45 = vmax.f32 %v656_v41, %v657_v42  ;;  %v648_v47 = vsel %vm640_vm5, -1e+10, %v632_v43  ;;  %v633_v49 = vmul.f32 0.25, %v615_v44  ;;  %vm944_vm5 = vcmask 1047559  }
 0x25b   : > { %v663_v50 = vsel %vm655_vm4, %v648_v47, -inf }
 0x25c   : > { %v659_v17 = vrot.slane %v658_v45, 2  ;;  %v664_v51 = vrot.slane %v663_v50, 4  ;;  %v649_v52 = vsel %vm641_vm6, -1e+10, %v633_v49 }
 0x25d   : > { %v670_v53 = vsel %vm655_vm4, %v649_v52, -inf  ;;  %v618_v56 = vpop.xlane.xlu1 %617 }
 0x25e   : > { %v660_v18 = vmax.f32 %v658_v45, %v659_v17  ;;  %v665_v57 = vmax.f32 %v663_v50, %v664_v51  ;;  %v671_v58 = vrot.slane %v670_v53, 4  ;;  %v634_v59 = vmul.f32 0.25, %v618_v56 }
 0x260   : > { %v661_v60 = vrot.slane %v660_v18, 1  ;;  %v666_v22 = vrot.slane %v665_v57, 2  ;;  %v672_v63 = vmax.f32 %v670_v53, %v671_v58  ;;  %v650_v0 = vsel %vm642_vm7, -1e+10, %v634_v59 }
 0x261   : > { %v677_v1 = vsel %vm655_vm4, %v650_v0, -inf  ;;  %v621_v3 = vpop.xlane.xlu0 %620 }
 0x262   : > { %v662_v6 = vmax.f32 %v660_v18, %v661_v60  ;;  %v667_v9 = vmax.f32 %v665_v57, %v666_v22  ;;  %v673_v11 = vrot.slane %v672_v63, 2  ;;  %v678_v12 = vrot.slane %v677_v1, 4 }
 0x263   : > { %v635_v15 = vmul.f32 0.25, %v621_v3 }
 0x264   : > { %v712_v26 = vsub.f32 %v647_v38, %v662_v6  ;;  %v668_v19 = vrot.slane %v667_v9, 1  ;;  %v674_v23 = vmax.f32 %v672_v63, %v673_v11  ;;  %v679_v24 = vmax.f32 %v677_v1, %v678_v12 }
 0x265   : > { %v651_v28 = vsel %vm643_vm8, -1e+10, %v635_v15  ;;  %v624_v29 = vpop.xlane.xlu1 %623 }
 0x266   : > { %v720_v31 = vmul.f32 1.442695, %v712_v26  ;;  %v669_v35 = vmax.f32 %v667_v9, %v668_v19  ;;  %v675_v36 = vrot.slane %v674_v23, 1  ;;  %v680_v37 = vrot.slane %v679_v24, 2 }
 0x267   : > { %v684_v30 = vsel %vm655_vm4, %v651_v28, -inf  ;;  %v636_v41 = vmul.f32 0.25, %v624_v29 }
 0x268   : > { %1569 = vpow2.f32 %v720_v31  ;;  %v713_v13 = vsub.f32 %v648_v47, %v669_v35  ;;  %v676_v42 = vmax.f32 %v674_v23, %v675_v36  ;;  %v681_v43 = vmax.f32 %v679_v24, %v680_v37 }
 0x269   : > { %v685_v44 = vrot.slane %v684_v30, 4  ;;  %v652_v38 = vsel %vm644_vm9, -1e+10, %v636_v41  ;;  %v627_v45 = vpop.xlane.xlu0 %626 }
 0x26a   : > { %v722_v49 = vmul.f32 1.442695, %v713_v13  ;;  %v714_v50 = vsub.f32 %v649_v52, %v676_v42  ;;  %v682_v32 = vrot.slane %v681_v43, 1  ;;  %v691_v17 = vsel %vm655_vm4, %v652_v38, -inf }
 0x26b   : > { %v686_v51 = vmax.f32 %v684_v30, %v685_v44  ;;  %v692_v53 = vrot.slane %v691_v17, 4  ;;  %v637_v56 = vmul.f32 0.25, %v627_v45 }
 0x26c   : > { %1571 = vpow2.f32 %v722_v49  ;;  %v724_v18 = vmul.f32 1.442695, %v714_v50  ;;  %v683_v57 = vmax.f32 %v681_v43, %v682_v32 }
 0x26d   : > { %v687_v58 = vrot.slane %v686_v51, 2  ;;  %v693_v47 = vmax.f32 %v691_v17, %v692_v53  ;;  %v653_v59 = vsel %vm645_vm10, -1e+10, %v637_v56  ;;  %v630_v60 = vpop.xlane.xlu1 %629 }
 0x26e   : > { %1573 = vpow2.f32 %v724_v18  ;;  %v715_v33 = vsub.f32 %v650_v0, %v683_v57  ;;  %v698_v22 = vsel %vm655_vm4, %v653_v59, -inf  ;;  %v638_v52 = vmul.f32 0.25, %v630_v60 }
 0x26f   : > { %v688_v63 = vmax.f32 %v686_v51, %v687_v58  ;;  %v694_v1 = vrot.slane %v693_v47, 2  ;;  %v699_v3 = vrot.slane %v698_v22, 4 }
 0x270   : > { %v726_v6 = vmul.f32 1.442695, %v715_v33  ;;  %v654_v9 = vsel %vm646_vm11, -1e+10, %v638_v52 }
 0x271   : > { %v689_v11 = vrot.slane %v688_v63, 1  ;;  %v695_v12 = vmax.f32 %v693_v47, %v694_v1  ;;  %v700_v15 = vmax.f32 %v698_v22, %v699_v3  ;;  %v705_v26 = vsel %vm655_vm4, %v654_v9, -inf }
 0x272   : > { %v1890_v19 = vpop.eup %1569  ;;  %1575 = vpow2.f32 %v726_v6  ;;  %v706_v34 = vrot.slane %v705_v26, 4 }
 0x273   : > { %v736_v0 = vsel %vm655_vm4, %v1890_v19, 0.0  ;;  %v690_v23 = vmax.f32 %v688_v63, %v689_v11  ;;  %v696_v24 = vrot.slane %v695_v12, 1  ;;  %v701_v29 = vrot.slane %v700_v15, 2 }
 0x274   : > { %v737_v31 = vrot.slane %v736_v0, 4  ;;  %v707_v35 = vmax.f32 %v705_v26, %v706_v34 }
 0x275   : > { %v716_v36 = vsub.f32 %v651_v28, %v690_v23  ;;  %v697_v37 = vmax.f32 %v695_v12, %v696_v24  ;;  %v702_v30 = vmax.f32 %v700_v15, %v701_v29 }
 0x276   : > { %v1894_v41 = vpop.eup %1571  ;;  %v738_v13 = vadd.f32 %v737_v31, %v736_v0  ;;  %v708_v42 = vrot.slane %v707_v35, 2 }
 0x277   : > { %v743_v43 = vsel %vm655_vm4, %v1894_v41, 0.0  ;;  %v728_v44 = vmul.f32 1.442695, %v716_v36  ;;  %v717_v45 = vsub.f32 %v652_v38, %v697_v37  ;;  %v703_v49 = vrot.slane %v702_v30, 1 }
 0x278   : > { %v1898_v50 = vpop.eup %1573  ;;  %v739_v32 = vrot.slane %v738_v13, 2  ;;  %v744_v17 = vrot.slane %v743_v43, 4  ;;  %v709_v51 = vmax.f32 %v707_v35, %v708_v42 }
 0x279   : > { %v750_v28 = vsel %vm655_vm4, %v1898_v50, 0.0  ;;  %1577 = vpow2.f32 %v728_v44  ;;  %v730_v53 = vmul.f32 1.442695, %v717_v45  ;;  %v704_v56 = vmax.f32 %v702_v30, %v703_v49 }
 0x27a   : > { %v745_v18 = vadd.f32 %v744_v17, %v743_v43  ;;  %v751_v57 = vrot.slane %v750_v28, 4  ;;  %v710_v58 = vrot.slane %v709_v51, 1  ;;  %v740_v47 = vadd.f32 %v739_v32, %v738_v13 }
 0x27b   : > { %1579 = vpow2.f32 %v730_v53  ;;  %v718_v60 = vsub.f32 %v653_v59, %v704_v56 }
 0x27c   : > { %v1902_v33 = vpop.eup %1575  ;;  %v746_v38 = vrot.slane %v745_v18, 2  ;;  %v752_v22 = vadd.f32 %v751_v57, %v750_v28  ;;  %v711_v52 = vmax.f32 %v709_v51, %v710_v58  ;;  %v741_v63 = vrot.slane %v740_v47, 1 }
 0x27d   : > { %v757_v1 = vsel %vm655_vm4, %v1902_v33, 0.0  ;;  %v732_v3 = vmul.f32 1.442695, %v718_v60 }
 0x27e   : > { %v753_v6 = vrot.slane %v752_v22, 2  ;;  %v758_v11 = vrot.slane %v757_v1, 4  ;;  %v719_v12 = vsub.f32 %v654_v9, %v711_v52  ;;  %v742_v15 = vadd.f32 %v741_v63, %v740_v47 }
 0x27f   : > { %1581 = vpow2.f32 %v732_v3  ;;  %v747_v26 = vadd.f32 %v746_v38, %v745_v18 }
 0x280   : > { %v759_v34 = vadd.f32 %v758_v11, %v757_v1  ;;  %v734_v0 = vmul.f32 1.442695, %v719_v12  ;;  %1583 = vrcp.f32 %v742_v15  ;;  %v754_v59 = vadd.f32 %v753_v6, %v752_v22 }
 0x281   : > { %v748_v23 = vrot.slane %v747_v26, 1 }
 0x282   : > { %v760_v24 = vrot.slane %v759_v34, 2  ;;  %1585 = vpow2.f32 %v734_v0  ;;  %v755_v29 = vrot.slane %v754_v59, 1 }
 0x283   : > { %v1578_v31 = vpop.eup %1577  ;;  %v749_v35 = vadd.f32 %v748_v23, %v747_v26 }
 0x284   : > { %v764_v36 = vsel %vm655_vm4, %v1578_v31, 0.0  ;;  %v756_v37 = vadd.f32 %v755_v29, %v754_v59  ;;  %v761_v30 = vadd.f32 %v760_v24, %v759_v34 }
 0x285   : > { %v1580_v13 = vpop.eup %1579  ;;  %v765_v42 = vrot.slane %v764_v36, 4  ;;  %1587 = vrcp.f32 %v749_v35 }
 0x286   : > { %v771_v9 = vsel %vm655_vm4, %v1580_v13, 0.0  ;;  %v762_v43 = vrot.slane %v761_v30, 1  ;;  %1589 = vrcp.f32 %v756_v37 }
 0x287   : > { %v766_v44 = vadd.f32 %v765_v42, %v764_v36  ;;  %v772_v45 = vrot.slane %v771_v9, 4 }
 0x288   : > { %v763_v49 = vadd.f32 %v762_v43, %v761_v30 }
 0x289   : > { %v1582_v32 = vpop.eup %1581  ;;  %v767_v17 = vrot.slane %v766_v44, 2  ;;  %v773_v51 = vadd.f32 %v772_v45, %v771_v9 }
 0x28a   : > { %v1584_v28 = vpop.eup %1583  ;;  %v778_v53 = vsel %vm655_vm4, %v1582_v32, 0.0  ;;  %1591 = vrcp.f32 %v763_v49 }
 0x28b   : > { %v774_v56 = vrot.slane %v773_v51, 2  ;;  %v779_v18 = vrot.slane %v778_v53, 4  ;;  %v800_v57 = vmul.f32 %v1584_v28, %v1890_v19  ;;  %v768_v58 = vadd.f32 %v767_v17, %v766_v44  ;;  %v206_v17 = vld [vmem:[%s2053_s2 + $0x90] sm:$0xff] }
 0x28c   : > { %v1586_v47 = vpop.eup %1585  ;;  %v210_v28 = vld [vmem:[%s2053_s2 + $0xb0] sm:$0xff] }
 0x28d   : > { %v780_v60 = vadd.f32 %v779_v18, %v778_v53  ;;  %v785_v38 = vsel %vm655_vm4, %v1586_v47, 0.0  ;;  %810 = vperm.xlu0 %1567, %v800_v57   ;;  %v769_v22 = vrot.slane %v768_v58, 1  ;;  %v775_v52 = vadd.f32 %v774_v56, %v773_v51  ;;  %v211_v53 = vld [vmem:[%s2053_s2 + $0xb8] sm:$0xff]  ;;  %v212_v18 = vld [vmem:[%s2053_s2 + $0xc0] sm:$0xff]  ;;  %v213_v57 = vld [vmem:[%s2053_s2 + $0xc8] sm:$0xff] }
 0x28e   : > { %v786_v63 = vrot.slane %v785_v38, 4  ;;  %v1525_v56 = vpack.c.bf16 %v211_v53, %v210_v28 }
 0x28f   : > { %v1588_v1 = vpop.eup %1587  ;;  %v781_v3 = vrot.slane %v780_v60, 2  ;;  %v770_v6 = vadd.f32 %v769_v22, %v768_v58  ;;  %v776_v11 = vrot.slane %v775_v52, 1  ;;  %v1528_v58 = vpack.c.bf16 %v213_v57, %v212_v18 }
 0x290   : > { %v787_v12 = vadd.f32 %v786_v63, %v785_v38  ;;  %v801_v15 = vmul.f32 %v1588_v1, %v1894_v41  ;;  %v1590_v26 = vpop.eup %1589 }
 0x291   : > { %1593 = vrcp.f32 %v770_v6  ;;  %v777_v34 = vadd.f32 %v776_v11, %v775_v52  ;;  %v782_v19 = vadd.f32 %v781_v3, %v780_v60  ;;  %v802_v24 = vmul.f32 %v1590_v26, %v1898_v50 }
 0x292   : > { %v788_v0 = vrot.slane %v787_v12, 2  ;;  %815 = vperm.xlu1 %1568, %v801_v15  }
 0x293   : > { %1595 = vrcp.f32 %v777_v34  ;;  %v783_v59 = vrot.slane %v782_v19, 1 }
 0x294   : > { %v1592_v23 = vpop.eup %1591  ;;  %v789_v29 = vadd.f32 %v788_v0, %v787_v12 }
 0x295   : > { %v784_v35 = vadd.f32 %v783_v59, %v782_v19  ;;  %v803_v37 = vmul.f32 %v1592_v23, %v1902_v33  ;;  %v207_v33 = vld [vmem:[%s2053_s2 + $0x98] sm:$0xff] }
 0x296   : > { %820 = vperm.xlu1 %1568, %v802_v24   ;;  %v790_v36 = vrot.slane %v789_v29, 1  ;;  %v1519_v51 = vpack.c.bf16 %v207_v33, %v206_v17 }
 0x297   : > { %1597 = vrcp.f32 %v784_v35 }
 0x298   : > { %v791_v30 = vadd.f32 %v790_v36, %v789_v29  ;;  %1520 = vmatpush3.bf16.msra.mxu0 %v1519_v51 }
 0x299   : > { %1521 = vmatprep.subr.bf16.mxu0 %v1613_v2 }
 0x29a   : > { %825 = vperm.xlu1 %1568, %v803_v37   ;;  %1599 = vrcp.f32 %v791_v30 }
 0x29b   : > { %v1594_v41 = vpop.eup %1593 }
 0x29c   : > { %v804_v42 = vmul.f32 %v1594_v41, %v1578_v31  ;;  %v208_v31 = vld [vmem:[%s2053_s2 + $0xa0] sm:$0xff] }
 0x29d   : > { %v1596_v9 = vpop.eup %1595 }
 0x29e   : > { %830 = vperm.xlu1 %1568, %v804_v42   ;;  %v805_v43 = vmul.f32 %v1596_v9, %v1580_v13  ;;  %v209_v13 = vld [vmem:[%s2053_s2 + $0xa8] sm:$0xff] }
 0x2a1   : > { %v1598_v44 = vpop.eup %1597 }
 0x2a2   : > { %835 = vperm.xlu1 %1568, %v805_v43   ;;  %v806_v45 = vmul.f32 %v1598_v44, %v1582_v32  ;;  %v1522_v32 = vpack.c.bf16 %v209_v13, %v208_v31 }
 0x2a4   : > { %v1600_v49 = vpop.eup %1599  ;;  %1523 = vmatpush3.bf16.msra.mxu0 %v1522_v32 }
 0x2a5   : > { %v807_v50 = vmul.f32 %v1600_v49, %v1586_v47  ;;  %1524 = vmatprep.subr.bf16.mxu0 %v1613_v2 }
 0x2a6   : > { %840 = vperm.xlu1 %1568, %v806_v45  }
 0x2a8   : > { %1526 = vmatpush3.bf16.msra.mxu0 %v1525_v56 }
 0x2a9   : > { %1527 = vmatprep.subr.bf16.mxu0 %v1613_v2 }
 0x2aa   : > { %845 = vperm.xlu1 %1568, %v807_v50  }
 0x2ac   : > { %1529 = vmatpush3.bf16.msra.mxu0 %v1528_v58 }
 0x2ad   : > { %1530 = vmatprep.subr.bf16.mxu0 %v1613_v2 }
 0x30c   : > { %v811_v47 = vpop.permute.xlu0 %810 }
 0x30d   : > { %v848_v22 = vmul.f32 %v811_v47, %v500_v16 }
 0x30f   : > { %v856_v3 = vsel %vm606_vm2, %v848_v22, 0.0 }
 0x311   : > { %v816_v60 = vpop.permute.xlu1 %815 }
 0x312   : > { %v849_v38 = vmul.f32 %v816_v60, %v501_v27  ;;  %v857_v27 = vrot.slane %v856_v3, 4 }
 0x314   : > { %v863_v63 = vsel %vm606_vm2, %v849_v38, 0.0 }
 0x315   : > { %v821_v52 = vpop.permute.xlu1 %820  ;;  %v864_v11 = vrot.slane %v863_v63, 4 }
 0x316   : > { %v850_v1 = vmul.f32 %v821_v52, %v502_v40  ;;  %v858_v40 = vadd.f32 %v857_v27, %v856_v3 }
 0x317   : > { %v865_v16 = vadd.f32 %v864_v11, %v863_v63 }
 0x318   : > { %v870_v6 = vsel %vm606_vm2, %v850_v1, 0.0 }
 0x319   : > { %v826_v12 = vpop.permute.xlu1 %825  ;;  %v871_v15 = vrot.slane %v870_v6, 4  ;;  %v866_v23 = vrot.slane %v865_v16, 2 }
 0x31a   : > { %v851_v25 = vmul.f32 %v826_v12, %v503_v48  ;;  %v859_v48 = vrot.slane %v858_v40, 2 }
 0x31b   : > { %v872_v19 = vadd.f32 %v871_v15, %v870_v6  ;;  %v867_v41 = vadd.f32 %v866_v23, %v865_v16 }
 0x31c   : > { %v877_v14 = vsel %vm606_vm2, %v851_v25, 0.0  ;;  %v860_v44 = vadd.f32 %v859_v48, %v858_v40 }
 0x31d   : > { %v878_v26 = vrot.slane %v877_v14, 4  ;;  %v831_v34 = vpop.permute.xlu1 %830  ;;  %v873_v35 = vrot.slane %v872_v19, 2 }
 0x31e   : > { %v852_v39 = vmul.f32 %v831_v34, %v504_v55  ;;  %v861_v32 = vrot.slane %v860_v44, 1 }
 0x31f   : > { %v879_v0 = vadd.f32 %v878_v26, %v877_v14  ;;  %v874_v9 = vadd.f32 %v873_v35, %v872_v19  ;;  %v1967_v14 = vand.u32 127, %v513_v5  ;;  %v214_v5 = vld [vmem:[%s2053_s2 + $0xd0] sm:$0xff] }
 0x320   : > { %v884_v59 = vsel %vm606_vm2, %v852_v39, 0.0  ;;  %v862_v38 = vadd.f32 %v861_v32, %v860_v44  ;;  %v221_v44 = vld [vmem:[%s2053_s2 + $0x108] sm:$0xff]  ;;  %v1273_v32 = vld [vmem:[%s2053_s2 + $0x150] ss:$0 sm:$0xff] }
 0x321   : > { %v885_v24 = vrot.slane %v884_v59, 4  ;;  %v836_v29 = vpop.permute.xlu1 %835  ;;  %v880_v36 = vrot.slane %v879_v0, 2  ;;  %v875_v31 = vrot.slane %v874_v9, 1  ;;  %vm922_vm4 = vcmp.lt.s32.totalorder %v1967_v14, 32 }
 0x322   : > { %v853_v46 = vmul.f32 %v836_v29, %v505_v62  ;;  %v868_v62 = vrot.slane %v867_v41, 1  ;;  %v912_v12 = vmax.f32 %v862_v38, 0.0  ;;  %v923_v48 = vsel %vm922_vm4, %v1811_v10, 0.0  ;;  %v218_v10 = vld [vmem:[%s2053_s2 + $0xf0] sm:$0xff] }
 0x323   : > { %v886_v37 = vadd.f32 %v885_v24, %v884_v59  ;;  %v881_v45 = vadd.f32 %v880_v36, %v879_v0  ;;  %v876_v60 = vadd.f32 %v875_v31, %v874_v9  ;;  %v215_v24 = vld [vmem:[%s2053_s2 + $0xd8] sm:$0xff]  ;;  %vm1182_vm6 = vcmp.eq.s32.totalorder %v1967_v14, 0 }
 0x324   : > { %v891_v30 = vsel %vm606_vm2, %v853_v46, 0.0  ;;  %v869_v18 = vadd.f32 %v868_v62, %v867_v41  ;;  %v216_v41 = vld [vmem:[%s2053_s2 + $0xe0] sm:$0xff]  ;;  %v227_v31 = vld [vmem:[%s2053_s2 + $0x138] sm:$0xff] }
 0x325   : > { %v887_v42 = vrot.slane %v886_v37, 2  ;;  %v892_v54 = vrot.slane %v891_v30, 4  ;;  %v841_v55 = vpop.permute.xlu1 %840  ;;  %v882_v28 = vrot.slane %v881_v45, 1  ;;  %v914_v11 = vmax.f32 %v876_v60, 0.0 }
 0x326   : > { %v854_v43 = vmul.f32 %v841_v55, %v506_v8  ;;  %v913_v3 = vmax.f32 %v869_v18, 0.0  ;;  %v219_v55 = vld [vmem:[%s2053_s2 + $0xf8] sm:$0xff]  ;;  %v229_v18 = vld [vmem:[%s2053_s2 + $0x148] sm:$0xff] }
 0x327   : > { %v893_v49 = vadd.f32 %v892_v54, %v891_v30  ;;  %v888_v50 = vadd.f32 %v887_v42, %v886_v37  ;;  %v883_v22 = vadd.f32 %v882_v28, %v881_v45  ;;  %v1531_v37 = vpack.c.bf16 %v215_v24, %v214_v5  ;;  %v217_v42 = vld [vmem:[%s2053_s2 + $0xe8] sm:$0xff] }
 0x328   : > { %v898_v61 = vsel %vm606_vm2, %v854_v43, 0.0  ;;  %v933_v26 = vsel %vm932_vm12, %v913_v3, %v912_v12  ;;  %v1534_v54 = vpack.c.bf16 %v217_v42, %v216_v41  ;;  %v1537_v9 = vpack.c.bf16 %v219_v55, %v218_v10  ;;  %v220_v43 = vld [vmem:[%s2053_s2 + $0x100] sm:$0xff] }
 0x329   : > { %v894_v17 = vrot.slane %v893_v49, 2  ;;  %v899_v33 = vrot.slane %v898_v61, 4  ;;  %v846_v51 = vpop.permute.xlu1 %845  ;;  %v889_v7 = vrot.slane %v888_v50, 1  ;;  %v915_v15 = vmax.f32 %v883_v22, 0.0  ;;  %v1277_v22 = vld [vmem:[%s2053_s2 + $0x160] ss:$0 sm:$0xff] }
 0x32a   : > { %v855_v13 = vmul.f32 %v846_v51, %v507_v21  ;;  %v935_v39 = vsel %vm934_vm13, %v914_v11, %v933_v26  ;;  %v1540_v45 = vpack.c.bf16 %v221_v44, %v220_v43  ;;  %v226_v51 = vld [vmem:[%s2053_s2 + $0x130] sm:$0xff] }
 0x32b   : > { %v895_v53 = vadd.f32 %v894_v17, %v893_v49  ;;  %v900_v56 = vadd.f32 %v899_v33, %v898_v61  ;;  %v890_v1 = vadd.f32 %v889_v7, %v888_v50  ;;  %v937_v0 = vsel %vm936_vm14, %v915_v15, %v935_v39  ;;  %v222_v49 = vld [vmem:[%s2053_s2 + $0x110] sm:$0xff]  ;;  %v223_v50 = vld [vmem:[%s2053_s2 + $0x118] sm:$0xff]  ;;  %v224_v61 = vld [vmem:[%s2053_s2 + $0x120] sm:$0xff] }
 0x32c   : > { %v905_v8 = vsel %vm606_vm2, %v855_v13, 0.0  ;;  %v1543_v62 = vpack.c.bf16 %v223_v50, %v222_v49  ;;  %v225_v17 = vld [vmem:[%s2053_s2 + $0x128] sm:$0xff]  ;;  %v1549_v13 = vpack.c.bf16 %v227_v31, %v226_v51 }
 0x32d   : > { %v896_v57 = vrot.slane %v895_v53, 1  ;;  %v901_v58 = vrot.slane %v900_v56, 2  ;;  %v906_v47 = vrot.slane %v905_v8, 4  ;;  %v916_v16 = vmax.f32 %v890_v1, 0.0 }
 0x32e   : > { %1544 = vmatpush3.bf16.msra.mxu1 %v1543_v62  ;;  %v1546_v33 = vpack.c.bf16 %v225_v17, %v224_v61 }
 0x32f   : > { %v902_v52 = vadd.f32 %v901_v58, %v900_v56  ;;  %v907_v63 = vadd.f32 %v906_v47, %v905_v8  ;;  %v897_v20 = vadd.f32 %v896_v57, %v895_v53  ;;  %v939_v23 = vsel %vm938_vm15, %v916_v16, %v937_v0  ;;  %1545 = vmatprep.subr.bf16.mxu1 %v1613_v2  ;;  %v228_v8 = vld [vmem:[%s2053_s2 + $0x140] sm:$0xff] }
 0x330   : > { %v1552_v57 = vpack.c.bf16 %v229_v18, %v228_v8 }
 0x331   : > { %v903_v21 = vrot.slane %v902_v52, 1  ;;  %v908_v6 = vrot.slane %v907_v63, 2  ;;  %v917_v34 = vmax.f32 %v897_v20, 0.0  ;;  %v1183_v20 = vsel %vm1182_vm6, 1.0, %v1615_v4 }
 0x332   : > { %1547 = vmatpush3.bf16.msra.mxu1 %v1546_v33 }
 0x333   : > { %v904_v25 = vadd.f32 %v903_v21, %v902_v52  ;;  %v909_v27 = vadd.f32 %v908_v6, %v907_v63  ;;  %v941_v29 = vsel %vm940_vm1, %v917_v34, %v939_v23  ;;  %1548 = vmatprep.subr.bf16.mxu1 %v1613_v2 }
 0x335   : > { %v910_v19 = vrot.slane %v909_v27, 1  ;;  %v918_v40 = vmax.f32 %v904_v25, 0.0 }
 0x336   : > { %1550 = vmatpush3.bf16.msra.mxu1 %v1549_v13 }
 0x337   : > { %v911_v59 = vadd.f32 %v910_v19, %v909_v27  ;;  %v943_v46 = vsel %vm942_vm3, %v918_v40, %v941_v29  ;;  %1551 = vmatprep.subr.bf16.mxu1 %v1613_v2 }
 0x339   : > { %v919_v35 = vmax.f32 %v911_v59, 0.0 }
 0x33a   : > { %1553 = vmatpush3.bf16.msra.mxu1 %v1552_v57 }
 0x33b   : > { %v945_v36 = vsel %vm944_vm5, %v919_v35, %v943_v46 }
 0x33c   : > { %v947_v30 = vadd.f32 %v945_v36, %v923_v48 }
 0x33e   : > { %1451 = vmatmul.mubr.msk.f32.vlgmr.msra.gmra.mrb[18].mxu0 %vm606_vm2, %v947_v30 }
 0x33f   : > { %1532 = vmatpush3.bf16.msra.mxu0 %v1531_v37  ;;  %1469 = vmatprep.mubr.msk.f32.mxu0 %vm1614_vm0, %v1615_v4  ;;  %vm1184_vm0 = vcmp.eq.s32.totalorder %v1967_v14, 1 }
 0x340   : > { %1533 = vmatprep.subr.bf16.mxu0 %v1613_v2  ;;  %v1185_v3 = vsel %vm1184_vm0, 3.1415927, %v1615_v4 }
 0x341   : > { %v1186_v6 = vsel %vm1182_vm6, 15.1, %v1185_v3 }
 0x343   : > { %1535 = vmatpush3.bf16.msra.mxu0 %v1534_v54 }
 0x344   : > { %1536 = vmatprep.subr.bf16.mxu0 %v1613_v2 }
 0x347   : > { %1538 = vmatpush3.bf16.msra.mxu0 %v1537_v9 }
 0x348   : > { %1539 = vmatprep.subr.bf16.mxu0 %v1613_v2  ;;  %v1275_v2 = vld [vmem:[%s2053_s2 + $0x158] ss:$0 sm:$0xff] }
 0x34b   : > { %1541 = vmatpush3.bf16.msra.mxu0 %v1540_v45 }
 0x411   : > { %v1021_v28 = vpop.f32.mrb[18].mxu0 }
 0x412   : > { %v1022_v53 = vadd.f32 %v1273_v32, %v1021_v28  ;;  %v1452_v56 = vpop.f32.mrb[19].mxu0 }
 0x414   : > { %v1025_v7 = vmax.f32 %v1022_v53, 0.0 }
 0x416   : > { %1470 = vmatmul.mubr.msk.f32.vlgmr.msra.gmra.mrb[20].mxu0 %vm606_vm2, %v1025_v7 }
 0x4e9   : > { %v1099_v58 = vpop.f32.mrb[20].mxu0 }
 0x4ea   : > { %v1100_v47 = vadd.f32 %v1275_v2, %v1099_v58  ;;  %v1471_v60 = vpop.f32.mrb[21].mxu0 }
 0x4ec   : > { %1601 = vtanh.f32 %v1100_v47 }
 0x4f6   : > { %v1602_v38 = vpop.eup %1601 }
 0x4f7   : > { %1489 = vmatmul.mubr.msk.f32.vlgmr.msra.gmra.mrb[18].mxu1 %vm606_vm2, %v1602_v38 }
 0x5ca   : > { %v1177_v52 = vpop.f32.mrb[18].mxu1 }
 0x5cb   : > { %v1178_v63 = vadd.f32 %v1277_v22, %v1177_v52  ;;  %v1490_v1 = vpop.f32.mrb[19].mxu1 }
 0x5cd   : > { %1603 = vtanh.f32 %v1178_v63 }
 0x5d7   : > { %v1604_v21 = vpop.eup %1603 }
 0x5d8   : > { %v1187_v11 = vadd.f32 %v1604_v21, %v1183_v20 }
 0x5da   : > { %v1188_v12 = vmul.f32 %v1187_v11, %v1186_v6 }
 0x5dc   : > { %1189 = vst [vmem:[%s187_s18] sm:$0xff] %v1188_v12 }
 0x5dd PF: > { %s13_s12 = sadd.s32 1, %s1611_s12  }
 0x5de   : > { %p10_p5 = scmp.ge.s32.totalorder %s13_s12, 4  }
 0x5e0   :  { %12 = sbr.rel (!%p10_p5) target bundleno = 1 (0x1), region = 65 }

</bundles_post_ra>
